<compile_context>
chip_gen: v6e
topology: v6e:2x2x1
jax: 0.10.0
libtpu: 0.0.40
codegen_flags: <defaults>
</compile_context>

<pallas_src>
import numpy as np
import jax
import jax.numpy as jnp
from jax.experimental import pallas as pl
from jax.experimental.pallas import tpu as pltpu

# ----------------------------- configuration --------------------------------
B = 2                 # batch
N_HALF = 2            # z has 2*N_HALF channels; coupling splits them in two
T = 128               # time steps per batch element (lane-aligned)
N_MEL = 8             # spect channels
N_SPEAKERS = 4
SPK_DIM = 4
N_COND = N_MEL + SPK_DIM
N_CHANNELS = 16       # WN hidden channels
DILATIONS = (1, 2, 4) # one dilated k=3 conv per layer
N_LAYERS = len(DILATIONS)

DTYPE = jnp.float32
MXU_DTYPE = jnp.bfloat16      # MXU operand dtype (accumulation stays f32)
GATE_DTYPE = jnp.bfloat16     # tanh/sigmoid dtype; use jnp.float32 on v5e

N_IN = N_HALF + N_COND + 1              # rows of the stacked [a0; cond; 1] operand
N_FUSED = N_CHANNELS + N_LAYERS * 2 * N_CHANNELS   # rows of the fused first matmul


# ------------------------------- Pallas kernel ------------------------------
def _wn_coupling_kernel(xin_ref, z_ref, fused_w_ref, in_w_ref, rs_w_ref,
                        end_w_ref, audio_out_ref, log_s_ref):
    """WN forward + affine coupling for one batch element, (channels, T) slabs."""
    C = N_CHANNELS
    xin = xin_ref[...]                         # (N_IN, T) bf16 : [a0; cond; 1]
    t_len = xin.shape[-1]

    # One fused MXU call: start 1x1 conv + every layer's conditioning
    # projection; start_b and (cond_b + in_b) ride the trailing ones row.
    h = jnp.dot(fused_w_ref[...], xin, preferred_element_type=jnp.float32)
    x = h[:C]                                  # (C, T) f32 hidden state

    ones_mxu = jnp.ones((1, t_len), MXU_DTYPE)   # bias row for res_skip convs

    skip = None
    for i, d in enumerate(DILATIONS):
        # dilated k=3 taps with 'same' zero padding: static lane slices +
        # zero-block concat, built in bf16 (cast x once, not the 3x taps).
        xb = x.astype(MXU_DTYPE)
        zpad = jnp.zeros((C, d), MXU_DTYPE)
        xl = jnp.concatenate([zpad, xb[:, :t_len - d]], axis=1)   # x[t-d]
        xr = jnp.concatenate([xb[:, d:], zpad], axis=1)           # x[t+d]
        taps = jnp.concatenate([xl, xb, xr], axis=0)              # (3C, T) bf16

        # in_b + cond_b are already folded into h's bias column.
        acts = (jnp.dot(in_w_ref[i], taps, preferred_element_type=jnp.float32)
                + h[C + 2 * C * i: C + 2 * C * (i + 1)])          # (2C, T) f32
        acts = acts.astype(GATE_DTYPE)
        gate = jnp.tanh(acts[:C]) * jax.nn.sigmoid(acts[C:])      # (C, T)
        # ones row folds rs_b into the res_skip matmul (no bias operand).
        gate_e = jnp.concatenate([gate.astype(MXU_DTYPE), ones_mxu], axis=0)

        if i < N_LAYERS - 1:
            rs = jnp.dot(rs_w_ref[i], gate_e,
                         preferred_element_type=jnp.float32)      # (2C, T)
            x = x + rs[:C]                                        # residual
            skip_inc = rs[C:]
        else:
            # last layer: only the skip rows; ref-level static slice so the
            # unused residual rows are never loaded.
            skip_inc = jnp.dot(rs_w_ref[i, C:, :], gate_e,
                               preferred_element_type=jnp.float32)
        skip = skip_inc if skip is None else skip + skip_inc

    # end 1x1 conv kept in f32 (feeds log_s directly); end_b folded via ones row.
    skip_e = jnp.concatenate([skip, jnp.ones((1, t_len), jnp.float32)], axis=0)
    out = jnp.dot(end_w_ref[...], skip_e, preferred_element_type=jnp.float32)
    log_s = out[:N_HALF]
    t = out[N_HALF:]

    a0 = z_ref[:N_HALF, :]
    a1 = z_ref[N_HALF:, :]
    # Full concatenated audio_out block written in-layout (a0 passthrough);
    # the output HBM buffer aliases z, so nothing is recopied if z is donated.
    audio_out_ref[...] = jnp.concatenate([a0, a1 * jnp.exp(log_s) + t], axis=0)
    log_s_ref[...] = log_s


# ------------------------------- wrapper -------------------------------------
def _pack_weights(params):
    """Fuse / fold parameters into the kernel's operand set (traced under jit)."""
    C, L = N_CHANNELS, N_LAYERS
    # block-diagonal [start | cond] weight with a trailing bias column
    fw = jnp.zeros((N_FUSED, N_IN), DTYPE)
    fw = fw.at[:C, :N_HALF].set(params["start_w"])
    fw = fw.at[:C, N_IN - 1:].set(params["start_b"])
    fw = fw.at[C:, N_HALF:N_HALF + N_COND].set(
        params["cond_w"].reshape(L * 2 * C, N_COND))
    fw = fw.at[C:, N_IN - 1:].set(
        (params["cond_b"] + params["in_b"]).reshape(L * 2 * C, 1))
    # k=3 dilated-conv taps fused into one (2C, 3C) weight per layer
    in_w = jnp.transpose(params["in_w"], (0, 2, 1, 3)).reshape(L, 2 * C, 3 * C)
    # res_skip / end weights with their biases as a trailing column
    rs_w = jnp.concatenate([params["rs_w"], params["rs_b"]], axis=2)
    end_w = jnp.concatenate([params["end_w"], params["end_b"]], axis=1)
    return (fw.astype(MXU_DTYPE), in_w.astype(MXU_DTYPE),
            rs_w.astype(MXU_DTYPE), end_w.astype(DTYPE))


@jax.jit
def affine_coupling_forward(z, spect, speaker_ids, params):
    """Forward pass of AffineCouplingBlock.forward (non-in-place semantics).

    z:           (B, 2*N_HALF, T) float32
    spect:       (B, N_MEL, T)    float32
    speaker_ids: (B,)             int32
    returns (audio_out (B, 2*N_HALF, T), log_s (B, N_HALF, T))
    """
    batch, n_group, t_len = z.shape
    n_half = n_group // 2

    # glue: speaker-embedding lookup, broadcast over time, stack with spect,
    # a0 and a ones row into the single MXU operand of the fused first matmul.
    spk = params["spk_table"][speaker_ids]                       # (B, SPK_DIM)
    spk = jnp.broadcast_to(spk[:, :, None], (batch, SPK_DIM, t_len))
    ones = jnp.ones((batch, 1, t_len), DTYPE)
    xin = jnp.concatenate([z[:, :n_half], spect, spk, ones],
                          axis=1).astype(MXU_DTYPE)              # (B, N_IN, T)

    fused_w, in_w, rs_w, end_w = _pack_weights(params)

    grid_spec = pltpu.PrefetchScalarGridSpec(
        num_scalar_prefetch=0,
        grid=(batch,),
        in_specs=[
            pl.BlockSpec((None, N_IN, t_len), lambda b: (b, 0, 0)),
            pl.BlockSpec((None, n_group, t_len), lambda b: (b, 0, 0)),
            # weights: constant index_maps -> fetched once, not per block
            pl.BlockSpec((N_FUSED, N_IN), lambda b: (0, 0)),
            pl.BlockSpec((N_LAYERS, 2 * N_CHANNELS, 3 * N_CHANNELS),
                         lambda b: (0, 0, 0)),
            pl.BlockSpec((N_LAYERS, 2 * N_CHANNELS, N_CHANNELS + 1),
                         lambda b: (0, 0, 0)),
            pl.BlockSpec((2 * N_HALF, N_CHANNELS + 1), lambda b: (0, 0)),
        ],
        out_specs=[
            pl.BlockSpec((None, n_group, t_len), lambda b: (b, 0, 0)),
            pl.BlockSpec((None, n_half, t_len), lambda b: (b, 0, 0)),
        ])

    audio_out, log_s = pl.pallas_call(
        _wn_coupling_kernel,
        out_shape=(jax.ShapeDtypeStruct((batch, n_group, t_len), DTYPE),
                   jax.ShapeDtypeStruct((batch, n_half, t_len), DTYPE)),
        grid_spec=grid_spec,
        input_output_aliases={1: 0},   # z buffer -> audio_out (a0 passthrough)
        compiler_params=pltpu.CompilerParams(
            dimension_semantics=("parallel",)),   # v7x: batch over both TCs
    )(xin, z, fused_w, in_w, rs_w, end_w)
    return audio_out, log_s


# --------------------------- pure-JAX reference ------------------------------
def _reference_forward(z, spect, speaker_ids, params):
    spk = params["spk_table"][speaker_ids]
    spk = jnp.broadcast_to(spk[:, :, None], (z.shape[0], SPK_DIM, z.shape[-1]))
    cond_all = jnp.concatenate([spect, spk], axis=1)
    a0_all, a1_all = jnp.split(z, 2, axis=1)

    outs, log_ss = [], []
    for b in range(z.shape[0]):
        a0, a1, cond = a0_all[b], a1_all[b], cond_all[b]
        x = params["start_w"] @ a0 + params["start_b"]
        skip = jnp.zeros((N_CHANNELS, T), DTYPE)
        for i, d in enumerate(DILATIONS):
            xp = jnp.pad(x, ((0, 0), (d, d)))
            xl = xp[:, :T]
            xr = xp[:, 2 * d:2 * d + T]
            acts = (params["in_w"][i, 0] @ xl + params["in_w"][i, 1] @ x
                    + params["in_w"][i, 2] @ xr + params["in_b"][i]
                    + params["cond_w"][i] @ cond + params["cond_b"][i])
            gate = jnp.tanh(acts[:N_CHANNELS]) * jax.nn.sigmoid(acts[N_CHANNELS:])
            rs = params["rs_w"][i] @ gate + params["rs_b"][i]
            if i < N_LAYERS - 1:
                x = x + rs[:N_CHANNELS]
            skip = skip + rs[N_CHANNELS:]
        out = params["end_w"] @ skip + params["end_b"]
        log_s, t = out[:N_HALF], out[N_HALF:]
        outs.append(jnp.concatenate([a0, a1 * jnp.exp(log_s) + t], axis=0))
        log_ss.append(log_s)
    return jnp.stack(outs, 0), jnp.stack(log_ss, 0)


# ------------------------------- main ----------------------------------------
def _init_params(key):
    ks = jax.random.split(key, 12)
    n = lambda k, shape, s: (s * jax.random.normal(k, shape)).astype(DTYPE)
    return {
        "start_w": n(ks[0], (N_CHANNELS, N_HALF), 0.1),
        "start_b": n(ks[1], (N_CHANNELS, 1), 0.02),
        "in_w":    n(ks[2], (N_LAYERS, 3, 2 * N_CHANNELS, N_CHANNELS), 0.1),
        "in_b":    n(ks[3], (N_LAYERS, 2 * N_CHANNELS, 1), 0.02),
        "cond_w":  n(ks[4], (N_LAYERS, 2 * N_CHANNELS, N_COND), 0.1),
        "cond_b":  n(ks[5], (N_LAYERS, 2 * N_CHANNELS, 1), 0.02),
        "rs_w":    n(ks[6], (N_LAYERS, 2 * N_CHANNELS, N_CHANNELS), 0.1),
        "rs_b":    n(ks[7], (N_LAYERS, 2 * N_CHANNELS, 1), 0.02),
        "end_w":   n(ks[8], (2 * N_HALF, N_CHANNELS), 0.1),
        "end_b":   n(ks[9], (2 * N_HALF, 1), 0.02),
        "spk_table": n(ks[10], (N_SPEAKERS, SPK_DIM), 0.5),
    }


if __name__ == "__main__":
    key = jax.random.PRNGKey(0)
    k_p, k_z, k_s, k_id = jax.random.split(key, 4)

    params = _init_params(k_p)
    z = jax.random.normal(k_z, (B, 2 * N_HALF, T), dtype=DTYPE)
    spect = jax.random.normal(k_s, (B, N_MEL, T), dtype=DTYPE)
    speaker_ids = jax.random.randint(k_id, (B,), 0, N_SPEAKERS, dtype=jnp.int32)

    audio_out, log_s = affine_coupling_forward(z, spect, speaker_ids, params)
    jax.block_until_ready((audio_out, log_s))

    # Sanity check against an all-f32 pure-JAX reference of the same forward
    # math.  Tolerances account for bf16 MXU operands + bf16 gate math; the
    # bf16 error in log_s is amplified by |a1|*exp(log_s) in the coupling,
    # hence the looser atol on audio_out.
    ref_out, ref_log_s = _reference_forward(z, spect, speaker_ids, params)
    np.testing.assert_allclose(np.asarray(log_s), np.asarray(ref_log_s),
                               rtol=3e-2, atol=3e-2)
    np.testing.assert_allclose(np.asarray(audio_out), np.asarray(ref_out),
                               rtol=3e-2, atol=8e-2)

    print("KERNEL_OK")
</pallas_src>

<mosaic_0001>
module attributes {stable_mosaic.version = 11 : i64} {
  func.func @_wn_coupling_kernel(%arg0: i32, %arg1: memref<1x15x128xbf16, #tpu.memory_space<vmem>>, %arg2: memref<1x4x128xf32, #tpu.memory_space<vmem>>, %arg3: memref<112x15xbf16, #tpu.memory_space<vmem>>, %arg4: memref<3x32x48xbf16, #tpu.memory_space<vmem>>, %arg5: memref<3x32x17xbf16, #tpu.memory_space<vmem>>, %arg6: memref<4x17xf32, #tpu.memory_space<vmem>>, %arg7: memref<1x4x128xf32, #tpu.memory_space<vmem>>, %arg8: memref<1x2x128xf32, #tpu.memory_space<vmem>>) attributes {dimension_semantics = [#tpu.dimension_semantics<parallel>], iteration_bounds = array<i64: 2>, scalar_prefetch = 0 : i64, scratch_operands = 0 : i64, tpu.core_type = #tpu.core_type<tc>, window_params = [{transform_indices = @transform_0, window_bounds = array<i64: 1, 15, 128>}, {transform_indices = @transform_1, window_bounds = array<i64: 1, 4, 128>}, {pipeline_mode = #tpu.pipeline_mode<synchronous>, transform_indices = @transform_2, window_bounds = array<i64: 112, 15>}, {pipeline_mode = #tpu.pipeline_mode<synchronous>, transform_indices = @transform_3, window_bounds = array<i64: 3, 32, 48>}, {pipeline_mode = #tpu.pipeline_mode<synchronous>, transform_indices = @transform_4, window_bounds = array<i64: 3, 32, 17>}, {pipeline_mode = #tpu.pipeline_mode<synchronous>, transform_indices = @transform_5, window_bounds = array<i64: 4, 17>}, {transform_indices = @transform_6, window_bounds = array<i64: 1, 4, 128>}, {transform_indices = @transform_7, window_bounds = array<i64: 1, 2, 128>}]} {
    %c0 = arith.constant 0 : index
    %c0_0 = arith.constant 0 : index
    %c0_1 = arith.constant 0 : index
    %0 = vector.load %arg1[%c0, %c0_0, %c0_1] : memref<1x15x128xbf16, #tpu.memory_space<vmem>>, vector<1x15x128xbf16>
    %1 = vector.shape_cast %0 : vector<1x15x128xbf16> to vector<15x128xbf16>
    %c0_2 = arith.constant 0 : index
    %c0_3 = arith.constant 0 : index
    %2 = vector.load %arg3[%c0_2, %c0_3] : memref<112x15xbf16, #tpu.memory_space<vmem>>, vector<112x15xbf16>
    %cst = arith.constant dense<0.000000e+00> : vector<112x128xf32>
    %3 = tpu.matmul %2, %1, %cst {dimension_numbers = #tpu.dot_dimension_numbers<[1], [0], [0], [1], [0, 0, 1, 1], [], []>} : vector<112x15xbf16>, vector<15x128xbf16>, vector<112x128xf32> -> vector<112x128xf32>
    %4 = vector.extract_strided_slice %3 {offsets = [0, 0], sizes = [16, 128], strides = [1, 1]} : vector<112x128xf32> to vector<16x128xf32>
    %cst_4 = arith.constant 1.000000e+00 : bf16
    %5 = vector.broadcast %cst_4 : bf16 to vector<1x128xbf16>
    %6 = arith.truncf %4 : vector<16x128xf32> to vector<16x128xbf16>
    %cst_5 = arith.constant 0.000000e+00 : bf16
    %7 = vector.broadcast %cst_5 : bf16 to vector<16x1xbf16>
    %8 = vector.extract_strided_slice %6 {offsets = [0, 0], sizes = [16, 127], strides = [1, 1]} : vector<16x128xbf16> to vector<16x127xbf16>
    %9 = tpu.concatenate %7, %8 in 1 : vector<16x1xbf16>, vector<16x127xbf16> -> vector<16x128xbf16>
    %10 = vector.extract_strided_slice %6 {offsets = [0, 1], sizes = [16, 127], strides = [1, 1]} : vector<16x128xbf16> to vector<16x127xbf16>
    %11 = tpu.concatenate %10, %7 in 1 : vector<16x127xbf16>, vector<16x1xbf16> -> vector<16x128xbf16>
    %12 = tpu.concatenate %9, %6, %11 in 0 : vector<16x128xbf16>, vector<16x128xbf16>, vector<16x128xbf16> -> vector<48x128xbf16>
    %c0_6 = arith.constant 0 : index
    %c0_7 = arith.constant 0 : index
    %c0_8 = arith.constant 0 : index
    %13 = vector.load %arg4[%c0_6, %c0_7, %c0_8] : memref<3x32x48xbf16, #tpu.memory_space<vmem>>, vector<1x32x48xbf16>
    %14 = vector.shape_cast %13 : vector<1x32x48xbf16> to vector<32x48xbf16>
    %cst_9 = arith.constant dense<0.000000e+00> : vector<32x128xf32>
    %15 = tpu.matmul %14, %12, %cst_9 {dimension_numbers = #tpu.dot_dimension_numbers<[1], [0], [0], [1], [0, 0, 1, 1], [], []>} : vector<32x48xbf16>, vector<48x128xbf16>, vector<32x128xf32> -> vector<32x128xf32>
    %16 = vector.extract_strided_slice %3 {offsets = [16, 0], sizes = [32, 128], strides = [1, 1]} : vector<112x128xf32> to vector<32x128xf32>
    %17 = arith.addf %15, %16 : vector<32x128xf32>
    %18 = arith.truncf %17 : vector<32x128xf32> to vector<32x128xbf16>
    %19 = vector.extract_strided_slice %18 {offsets = [0, 0], sizes = [16, 128], strides = [1, 1]} : vector<32x128xbf16> to vector<16x128xbf16>
    %20 = math.tanh %19 : vector<16x128xbf16>
    %21 = vector.extract_strided_slice %18 {offsets = [16, 0], sizes = [16, 128], strides = [1, 1]} : vector<32x128xbf16> to vector<16x128xbf16>
    %22 = arith.negf %21 : vector<16x128xbf16>
    %23 = math.exp %22 : vector<16x128xbf16>
    %cst_10 = arith.constant 1.000000e+00 : bf16
    %24 = vector.broadcast %cst_10 : bf16 to vector<16x128xbf16>
    %25 = arith.addf %24, %23 : vector<16x128xbf16>
    %26 = arith.divf %24, %25 : vector<16x128xbf16>
    %27 = arith.mulf %20, %26 : vector<16x128xbf16>
    %28 = tpu.concatenate %27, %5 in 0 : vector<16x128xbf16>, vector<1x128xbf16> -> vector<17x128xbf16>
    %c0_11 = arith.constant 0 : index
    %c0_12 = arith.constant 0 : index
    %c0_13 = arith.constant 0 : index
    %29 = vector.load %arg5[%c0_11, %c0_12, %c0_13] : memref<3x32x17xbf16, #tpu.memory_space<vmem>>, vector<1x32x17xbf16>
    %30 = vector.shape_cast %29 : vector<1x32x17xbf16> to vector<32x17xbf16>
    %cst_14 = arith.constant dense<0.000000e+00> : vector<32x128xf32>
    %31 = tpu.matmul %30, %28, %cst_14 {dimension_numbers = #tpu.dot_dimension_numbers<[1], [0], [0], [1], [0, 0, 1, 1], [], []>} : vector<32x17xbf16>, vector<17x128xbf16>, vector<32x128xf32> -> vector<32x128xf32>
    %32 = vector.extract_strided_slice %31 {offsets = [0, 0], sizes = [16, 128], strides = [1, 1]} : vector<32x128xf32> to vector<16x128xf32>
    %33 = arith.addf %4, %32 : vector<16x128xf32>
    %34 = vector.extract_strided_slice %31 {offsets = [16, 0], sizes = [16, 128], strides = [1, 1]} : vector<32x128xf32> to vector<16x128xf32>
    %35 = arith.truncf %33 : vector<16x128xf32> to vector<16x128xbf16>
    %cst_15 = arith.constant 0.000000e+00 : bf16
    %36 = vector.broadcast %cst_15 : bf16 to vector<16x2xbf16>
    %37 = vector.extract_strided_slice %35 {offsets = [0, 0], sizes = [16, 126], strides = [1, 1]} : vector<16x128xbf16> to vector<16x126xbf16>
    %38 = tpu.concatenate %36, %37 in 1 : vector<16x2xbf16>, vector<16x126xbf16> -> vector<16x128xbf16>
    %39 = vector.extract_strided_slice %35 {offsets = [0, 2], sizes = [16, 126], strides = [1, 1]} : vector<16x128xbf16> to vector<16x126xbf16>
    %40 = tpu.concatenate %39, %36 in 1 : vector<16x126xbf16>, vector<16x2xbf16> -> vector<16x128xbf16>
    %41 = tpu.concatenate %38, %35, %40 in 0 : vector<16x128xbf16>, vector<16x128xbf16>, vector<16x128xbf16> -> vector<48x128xbf16>
    %c1 = arith.constant 1 : index
    %c0_16 = arith.constant 0 : index
    %c0_17 = arith.constant 0 : index
    %42 = vector.load %arg4[%c1, %c0_16, %c0_17] : memref<3x32x48xbf16, #tpu.memory_space<vmem>>, vector<1x32x48xbf16>
    %43 = vector.shape_cast %42 : vector<1x32x48xbf16> to vector<32x48xbf16>
    %cst_18 = arith.constant dense<0.000000e+00> : vector<32x128xf32>
    %44 = tpu.matmul %43, %41, %cst_18 {dimension_numbers = #tpu.dot_dimension_numbers<[1], [0], [0], [1], [0, 0, 1, 1], [], []>} : vector<32x48xbf16>, vector<48x128xbf16>, vector<32x128xf32> -> vector<32x128xf32>
    %45 = vector.extract_strided_slice %3 {offsets = [48, 0], sizes = [32, 128], strides = [1, 1]} : vector<112x128xf32> to vector<32x128xf32>
    %46 = arith.addf %44, %45 : vector<32x128xf32>
    %47 = arith.truncf %46 : vector<32x128xf32> to vector<32x128xbf16>
    %48 = vector.extract_strided_slice %47 {offsets = [0, 0], sizes = [16, 128], strides = [1, 1]} : vector<32x128xbf16> to vector<16x128xbf16>
    %49 = math.tanh %48 : vector<16x128xbf16>
    %50 = vector.extract_strided_slice %47 {offsets = [16, 0], sizes = [16, 128], strides = [1, 1]} : vector<32x128xbf16> to vector<16x128xbf16>
    %51 = arith.negf %50 : vector<16x128xbf16>
    %52 = math.exp %51 : vector<16x128xbf16>
    %cst_19 = arith.constant 1.000000e+00 : bf16
    %53 = vector.broadcast %cst_19 : bf16 to vector<16x128xbf16>
    %54 = arith.addf %53, %52 : vector<16x128xbf16>
    %55 = arith.divf %53, %54 : vector<16x128xbf16>
    %56 = arith.mulf %49, %55 : vector<16x128xbf16>
    %57 = tpu.concatenate %56, %5 in 0 : vector<16x128xbf16>, vector<1x128xbf16> -> vector<17x128xbf16>
    %c1_20 = arith.constant 1 : index
    %c0_21 = arith.constant 0 : index
    %c0_22 = arith.constant 0 : index
    %58 = vector.load %arg5[%c1_20, %c0_21, %c0_22] : memref<3x32x17xbf16, #tpu.memory_space<vmem>>, vector<1x32x17xbf16>
    %59 = vector.shape_cast %58 : vector<1x32x17xbf16> to vector<32x17xbf16>
    %cst_23 = arith.constant dense<0.000000e+00> : vector<32x128xf32>
    %60 = tpu.matmul %59, %57, %cst_23 {dimension_numbers = #tpu.dot_dimension_numbers<[1], [0], [0], [1], [0, 0, 1, 1], [], []>} : vector<32x17xbf16>, vector<17x128xbf16>, vector<32x128xf32> -> vector<32x128xf32>
    %61 = vector.extract_strided_slice %60 {offsets = [0, 0], sizes = [16, 128], strides = [1, 1]} : vector<32x128xf32> to vector<16x128xf32>
    %62 = arith.addf %33, %61 : vector<16x128xf32>
    %63 = vector.extract_strided_slice %60 {offsets = [16, 0], sizes = [16, 128], strides = [1, 1]} : vector<32x128xf32> to vector<16x128xf32>
    %64 = arith.addf %34, %63 : vector<16x128xf32>
    %65 = arith.truncf %62 : vector<16x128xf32> to vector<16x128xbf16>
    %cst_24 = arith.constant 0.000000e+00 : bf16
    %66 = vector.broadcast %cst_24 : bf16 to vector<16x4xbf16>
    %67 = vector.extract_strided_slice %65 {offsets = [0, 0], sizes = [16, 124], strides = [1, 1]} : vector<16x128xbf16> to vector<16x124xbf16>
    %68 = tpu.concatenate %66, %67 in 1 : vector<16x4xbf16>, vector<16x124xbf16> -> vector<16x128xbf16>
    %69 = vector.extract_strided_slice %65 {offsets = [0, 4], sizes = [16, 124], strides = [1, 1]} : vector<16x128xbf16> to vector<16x124xbf16>
    %70 = tpu.concatenate %69, %66 in 1 : vector<16x124xbf16>, vector<16x4xbf16> -> vector<16x128xbf16>
    %71 = tpu.concatenate %68, %65, %70 in 0 : vector<16x128xbf16>, vector<16x128xbf16>, vector<16x128xbf16> -> vector<48x128xbf16>
    %c2 = arith.constant 2 : index
    %c0_25 = arith.constant 0 : index
    %c0_26 = arith.constant 0 : index
    %72 = vector.load %arg4[%c2, %c0_25, %c0_26] : memref<3x32x48xbf16, #tpu.memory_space<vmem>>, vector<1x32x48xbf16>
    %73 = vector.shape_cast %72 : vector<1x32x48xbf16> to vector<32x48xbf16>
    %cst_27 = arith.constant dense<0.000000e+00> : vector<32x128xf32>
    %74 = tpu.matmul %73, %71, %cst_27 {dimension_numbers = #tpu.dot_dimension_numbers<[1], [0], [0], [1], [0, 0, 1, 1], [], []>} : vector<32x48xbf16>, vector<48x128xbf16>, vector<32x128xf32> -> vector<32x128xf32>
    %75 = vector.extract_strided_slice %3 {offsets = [80, 0], sizes = [32, 128], strides = [1, 1]} : vector<112x128xf32> to vector<32x128xf32>
    %76 = arith.addf %74, %75 : vector<32x128xf32>
    %77 = arith.truncf %76 : vector<32x128xf32> to vector<32x128xbf16>
    %78 = vector.extract_strided_slice %77 {offsets = [0, 0], sizes = [16, 128], strides = [1, 1]} : vector<32x128xbf16> to vector<16x128xbf16>
    %79 = math.tanh %78 : vector<16x128xbf16>
    %80 = vector.extract_strided_slice %77 {offsets = [16, 0], sizes = [16, 128], strides = [1, 1]} : vector<32x128xbf16> to vector<16x128xbf16>
    %81 = arith.negf %80 : vector<16x128xbf16>
    %82 = math.exp %81 : vector<16x128xbf16>
    %cst_28 = arith.constant 1.000000e+00 : bf16
    %83 = vector.broadcast %cst_28 : bf16 to vector<16x128xbf16>
    %84 = arith.addf %83, %82 : vector<16x128xbf16>
    %85 = arith.divf %83, %84 : vector<16x128xbf16>
    %86 = arith.mulf %79, %85 : vector<16x128xbf16>
    %87 = tpu.concatenate %86, %5 in 0 : vector<16x128xbf16>, vector<1x128xbf16> -> vector<17x128xbf16>
    %c2_29 = arith.constant 2 : index
    %c16 = arith.constant 16 : index
    %c0_30 = arith.constant 0 : index
    %88 = vector.load %arg5[%c2_29, %c16, %c0_30] : memref<3x32x17xbf16, #tpu.memory_space<vmem>>, vector<1x16x17xbf16>
    %89 = vector.shape_cast %88 : vector<1x16x17xbf16> to vector<16x17xbf16>
    %cst_31 = arith.constant dense<0.000000e+00> : vector<16x128xf32>
    %90 = tpu.matmul %89, %87, %cst_31 {dimension_numbers = #tpu.dot_dimension_numbers<[1], [0], [0], [1], [0, 0, 1, 1], [], []>} : vector<16x17xbf16>, vector<17x128xbf16>, vector<16x128xf32> -> vector<16x128xf32>
    %91 = arith.addf %64, %90 : vector<16x128xf32>
    %cst_32 = arith.constant 1.000000e+00 : f32
    %92 = vector.broadcast %cst_32 : f32 to vector<1x128xf32>
    %93 = tpu.concatenate %91, %92 in 0 : vector<16x128xf32>, vector<1x128xf32> -> vector<17x128xf32>
    %c0_33 = arith.constant 0 : index
    %c0_34 = arith.constant 0 : index
    %94 = vector.load %arg6[%c0_33, %c0_34] : memref<4x17xf32, #tpu.memory_space<vmem>>, vector<4x17xf32>
    %cst_35 = arith.constant dense<0.000000e+00> : vector<4x128xf32>
    %95 = tpu.matmul %94, %93, %cst_35 {dimension_numbers = #tpu.dot_dimension_numbers<[1], [0], [0], [1], [0, 0, 1, 1], [], []>} : vector<4x17xf32>, vector<17x128xf32>, vector<4x128xf32> -> vector<4x128xf32>
    %96 = vector.extract_strided_slice %95 {offsets = [0, 0], sizes = [2, 128], strides = [1, 1]} : vector<4x128xf32> to vector<2x128xf32>
    %97 = vector.extract_strided_slice %95 {offsets = [2, 0], sizes = [2, 128], strides = [1, 1]} : vector<4x128xf32> to vector<2x128xf32>
    %c0_36 = arith.constant 0 : index
    %c0_37 = arith.constant 0 : index
    %c0_38 = arith.constant 0 : index
    %98 = vector.load %arg2[%c0_36, %c0_37, %c0_38] : memref<1x4x128xf32, #tpu.memory_space<vmem>>, vector<1x2x128xf32>
    %99 = vector.shape_cast %98 : vector<1x2x128xf32> to vector<2x128xf32>
    %c0_39 = arith.constant 0 : index
    %c2_40 = arith.constant 2 : index
    %c0_41 = arith.constant 0 : index
    %100 = vector.load %arg2[%c0_39, %c2_40, %c0_41] : memref<1x4x128xf32, #tpu.memory_space<vmem>>, vector<1x2x128xf32>
    %101 = vector.shape_cast %100 : vector<1x2x128xf32> to vector<2x128xf32>
    %102 = math.exp %96 : vector<2x128xf32>
    %103 = arith.mulf %101, %102 : vector<2x128xf32>
    %104 = arith.addf %103, %97 : vector<2x128xf32>
    %105 = tpu.concatenate %99, %104 in 0 : vector<2x128xf32>, vector<2x128xf32> -> vector<4x128xf32>
    %c0_42 = arith.constant 0 : index
    %c0_43 = arith.constant 0 : index
    %c0_44 = arith.constant 0 : index
    %106 = vector.load %arg7[%c0_42, %c0_43, %c0_44] : memref<1x4x128xf32, #tpu.memory_space<vmem>>, vector<1x4x128xf32>
    %107 = vector.shape_cast %106 : vector<1x4x128xf32> to vector<4x128xf32>
    %108 = vector.shape_cast %105 : vector<4x128xf32> to vector<1x4x128xf32>
    tpu.vector_store %arg7[%c0_42, %c0_43, %c0_44], %108 {strides = array<i32>} : memref<1x4x128xf32, #tpu.memory_space<vmem>>, vector<1x4x128xf32>,
    %c0_45 = arith.constant 0 : index
    %c0_46 = arith.constant 0 : index
    %c0_47 = arith.constant 0 : index
    %109 = vector.load %arg8[%c0_45, %c0_46, %c0_47] : memref<1x2x128xf32, #tpu.memory_space<vmem>>, vector<1x2x128xf32>
    %110 = vector.shape_cast %109 : vector<1x2x128xf32> to vector<2x128xf32>
    %111 = vector.shape_cast %96 : vector<2x128xf32> to vector<1x2x128xf32>
    tpu.vector_store %arg8[%c0_45, %c0_46, %c0_47], %111 {strides = array<i32>} : memref<1x2x128xf32, #tpu.memory_space<vmem>>, vector<1x2x128xf32>,
    return
  }
  func.func @transform_0(%arg0: i32) -> (i32, i32, i32) {
    %c0_i32 = arith.constant 0 : i32
    %c0_i32_0 = arith.constant 0 : i32
    %c0_i32_1 = arith.constant 0 : i32
    return %arg0, %c0_i32, %c0_i32_0 : i32, i32, i32
  }
  func.func @transform_1(%arg0: i32) -> (i32, i32, i32) {
    %c0_i32 = arith.constant 0 : i32
    %c0_i32_0 = arith.constant 0 : i32
    %c0_i32_1 = arith.constant 0 : i32
    return %arg0, %c0_i32, %c0_i32_0 : i32, i32, i32
  }
  func.func @transform_2(%arg0: i32) -> (i32, i32) {
    %c0_i32 = arith.constant 0 : i32
    %c0_i32_0 = arith.constant 0 : i32
    %c0_i32_1 = arith.constant 0 : i32
    return %c0_i32, %c0_i32_0 : i32, i32
  }
  func.func @transform_3(%arg0: i32) -> (i32, i32, i32) {
    %c0_i32 = arith.constant 0 : i32
    %c0_i32_0 = arith.constant 0 : i32
    %c0_i32_1 = arith.constant 0 : i32
    %c0_i32_2 = arith.constant 0 : i32
    return %c0_i32, %c0_i32_0, %c0_i32_1 : i32, i32, i32
  }
  func.func @transform_4(%arg0: i32) -> (i32, i32, i32) {
    %c0_i32 = arith.constant 0 : i32
    %c0_i32_0 = arith.constant 0 : i32
    %c0_i32_1 = arith.constant 0 : i32
    %c0_i32_2 = arith.constant 0 : i32
    return %c0_i32, %c0_i32_0, %c0_i32_1 : i32, i32, i32
  }
  func.func @transform_5(%arg0: i32) -> (i32, i32) {
    %c0_i32 = arith.constant 0 : i32
    %c0_i32_0 = arith.constant 0 : i32
    %c0_i32_1 = arith.constant 0 : i32
    return %c0_i32, %c0_i32_0 : i32, i32
  }
  func.func @transform_6(%arg0: i32) -> (i32, i32, i32) {
    %c0_i32 = arith.constant 0 : i32
    %c0_i32_0 = arith.constant 0 : i32
    %c0_i32_1 = arith.constant 0 : i32
    return %arg0, %c0_i32, %c0_i32_0 : i32, i32, i32
  }
  func.func @transform_7(%arg0: i32) -> (i32, i32, i32) {
    %c0_i32 = arith.constant 0 : i32
    %c0_i32_0 = arith.constant 0 : i32
    %c0_i32_1 = arith.constant 0 : i32
    return %arg0, %c0_i32, %c0_i32_0 : i32, i32, i32
  }
}

</mosaic_0001>

<bundles_post_ra>
// kernel: affine_coupling_forward.1
= control target key start
LH: loop header
LB: loop body
LE: loop exit
PB: predicated region body
PF: predicated region fallthrough
CT: control target
= control target key end

     0   :  { %13 = vsyncpa [#allocation3], 0  ;;  %s2052_s0 = inlined_call_operand.vmem [shape: bf16[2,15,128], index: 0, kind: input, shape index: {}]   ;;  %s2053_s1 = inlined_call_operand.hbm [shape: f32[2,4,128], index: 1, kind: input, shape index: {}, may-alias: {1,6}]   ;;  %s2054_s2 = inlined_call_operand.vmem [shape: bf16[112,15], index: 2, kind: input, shape index: {}]   ;;  %s2055_s3 = inlined_call_operand.vmem [shape: bf16[3,32,48], index: 3, kind: input, shape index: {}]   ;;  %s2056_s4 = inlined_call_operand.vmem [shape: bf16[3,32,17], index: 4, kind: input, shape index: {}]   ;;  %s2057_s5 = inlined_call_operand.vmem [shape: f32[4,17], index: 5, kind: input, shape index: {}]   ;;  %s2058_s6 = inlined_call_operand.hbm [shape: f32[2,4,128], index: 6, kind: output, shape index: {0}, may-alias: {1,6}]   ;;  %s2059_s7 = inlined_call_operand.hbm [shape: f32[2,2,128], index: 7, kind: output, shape index: {1}]  }
   0x1   :  { %15 = vsyncpa [#allocation3 + $0x1], 0 }
   0x2   :  { %16 = vsyncpa [#allocation4], 0 }
   0x3   :  { %18 = vsyncpa [#allocation4 + $0x1], 0 }
   0x4   :  { %19 = vsyncpa [#allocation7], 0 }
   0x5   :  { %21 = vsyncpa [#allocation7 + $0x1], 0  ;;  %s1725_s24 = smov 0   ;;  %s1727_s25 = smov 0  }
   0x6   :  { %s1729_s26 = smov 0   ;;  %s1731_s27 = smov 0  }
   0x7 LB: > { %s1746_s28 = sadd.s32 4294967295, %s1669_s27   ;;  %s1232_s29 = sadd.s32 4294967294, %s1669_s27   ;;  %s1669_s27 = sphi %s1731_s27, %s2078_s27   ;;  %s1665_s26 = sphi %s1729_s26, %s2077_s26   ;;  %s1661_s25 = sphi %s1727_s25, %s2076_s25   ;;  %s1657_s24 = sphi %s1725_s24, %s2075_s24  }
   0x8   : > { %s1750_s30 = sadd.s32 1, %s1669_s27   ;;  %s60_s8 = sadd.s32 1, %s1665_s26 }
   0x9   : > { %s57_s9 = ssub.s32 %s1669_s27, %s1750_s30  ;;  %p67_p0 = scmp.ne.s32.totalorder %s1665_s26, %s1661_s25 }
   0xa   : > { %p58_p1 = scmp.eq.s32.totalorder %s57_s9, 0  ;;  %p68_p2 = scmp.eq.s32.totalorder %s1669_s27, 0 }
   0xb   : > { %p73_p3 = scmp.ne.s32.totalorder %s1661_s25, %s1657_s24  ;;  %p74_p4 = scmp.eq.s32.totalorder %s1746_s28, 0 }
   0xc   : > { %s1762_s10 = scalar_select %p58_p1, %s1665_s26, %s60_s8  }
   0xd   : > { %p1764_p5 = por %p68_p2, %p67_p0  ;;  %p1768_p6 = por %p74_p4, %p73_p3 }
   0xe   : > { %p181_p7 = scmp.eq.s32.totalorder %s1746_s28, 1  ;;  %p187_p8 = scmp.eq.s32.totalorder %s1232_s29, 1 }
   0xf   : > { %s2064_s12 = scalar_select %p1768_p6, 1, 0 }
  0x10   : > { %p1463_p10 = scmp.lt.s32.totalorder %s1669_s27, 2  ;;  %p1775_p11 = por %p181_p7, %p67_p0 }
  0x11   : > { %p1779_p12 = por %p187_p8, %p73_p3  ;;  %s253_s15 = sand.u32 1, %s1665_s26  }
  0x12   : > { %s2065_s13 = scalar_select %p1775_p11, 1, 0 }
  0x13   : > { %s2066_s14 = scalar_select %p1779_p12, 1, 0 }
  0x14   : > { %s1236_s16 = sshll.u32 %s1669_s27, 6  ;;  %s1235_s17 = sshll.u32 %s253_s15, 2 }
  0x15   : > { %s1788_s20 = scalar_lea.hbm %s2053_s1, %s1236_s16  ;;  %s257_s21 = scalar_lea.vmem [#allocation2], %s1235_s17 }
  0x16   : > { %s264_s22 = sshll.u32 %s257_s21, 4  ;;  %p1792_p13 = pnand %p1463_p10, %p1764_p5  ;;  %s1796_s22 = int_to_ptr.vmem [resolvable:$true] %s264_s22 }
  0x17   : > { %s254_s29 = scalar_lea.sflag [#allocation3], %s253_s15  ;;  %s1547_s8 = scalar_lea.hbm %s1788_s20, 64 }
  0x18   : > { %p1548_p2 = scmp.ne.s32.totalorder %s1788_s20, %s1547_s8  ;;  %p1549_p3 = pneg %p1792_p13 }
  0x19   : > { %s1552_s11 = scalar_lea.hbm %s2053_s1, 128  ;;  %p1553_p5 = scmp.lt.s32.totalorder %s1788_s20, %s2053_s1 }
  0x1a   : > { %p1550_p4 = pnand %p1549_p3, %p1548_p2  ;;  %p1554_p8 = scmp.lt.s32.totalorder %s1552_s11, %s1547_s8 }
  0x1c   : > { %p1551_p7 = pneg %p1550_p4  ;;  %p1555_p10 = por %p1554_p8, %p1553_p5 }
  0x1e   : > { %p1556_p9 = pnand %p1555_p10, %p1551_p7 }
  0x20   : > { %1559 = shalt.err (!%p1556_p9)
}
  0x21   : > { %s1560_s15 = scalar_lea.vmem %s1796_s22, 64  ;;  %s1671_s19 = smov [#allocation2]  }
  0x22   : > { %p1561_p0 = scmp.ne.s32.totalorder %s1796_s22, %s1560_s15  ;;  %s1565_s21 = sshll.u32 %s1671_s19, 4  ;;  %s1566_s21 = int_to_ptr.vmem [resolvable:$false] %s1565_s21 }
  0x23   : > { %s1567_s9 = scalar_lea.vmem %s1566_s21, 128  ;;  %p1568_p4 = scmp.lt.s32.totalorder %s1796_s22, %s1566_s21 }
  0x24   : > { %p1563_p1 = pnand %p1561_p0, %p1549_p3  ;;  %p1569_p12 = scmp.lt.s32.totalorder %s1567_s9, %s1560_s15 }
  0x26   : > { %p1564_p2 = pneg %p1563_p1  ;;  %p1570_p11 = por %p1569_p12, %p1568_p4 }
  0x28   : > { %p1571_p6 = pnand %p1570_p11, %p1564_p2 }
  0x2a   : > { %1574 = shalt.err (!%p1571_p6)
}
  0x2b   : > { %1455 = dma.hbm_to_vmem [thread:$0]  (!%p1792_p13), %s1788_s20, 64, %s1796_s22, %s254_s29  }
  0x2c   : > { %p2068_p9 = scmp.lt.s32.totalorder %s1669_s27, 3  ;;  %p2069_p7 = scmp.ge.s32.totalorder %s1669_s27, 1 }
  0x2e   : > { %p270_p0 = pnand %p2069_p7, %p2068_p9 }
  0x2f   : > { %s1823_s8 = sand.u32 (!%p270_p0), 1, %s1661_s25   ;;  %p2070_p6 = scmp.ne.s32.totalorder (!%p270_p0), %s2064_s12, 0 }
  0x30   : > { %273 = sbr.rel (%p270_p0) target bundleno = 2222 (0x8ae), region = 44  ;;  %s2062_s16 = sshll.u32 (!%p270_p0), %s1823_s8, 2 }
  0x31   : > { %s276_s11 = scalar_lea.sflag (!%p270_p0), [#allocation3], %s1823_s8  ;;  %s1829_s23 = scalar_lea.vmem (!%p270_p0), [#allocation2], %s2062_s16 }
  0x35   : > { %1644 = dma.done.wait (%p2070_p6), %s276_s11, 64  }
  0x36   : > { %1646 = vsyncadd (%p2070_p6), %s276_s11, 4294967232  ;;  %p320_p11 = scmp.lt.s32.totalorder %s1746_s28, 1  ;;  %vm405_vm0 = vcmask 1046528   ;;  %v1672_v0 = vmov 0.0   ;;  %vm1673_vm1 = vmmov 0   ;;  %vm406_vm2 = vcmask 1047552  }
  0x37   : > { %1350 = vmatprep.subr.bf16.mxu0 %v1672_v0  ;;  %1352 = vmatprep.mubr.msk.bf16.mxu0 %vm1673_vm1, %v1672_v0  ;;  %v1674_v1 = vmov 65535   ;;  %v1509_v5 = vld [vmem:[%s2054_s2] sm:$0xff]   ;;  %vm383_vm3 = vcmask 121856   ;;  %v1510_v7 = vld [vmem:[%s2054_s2 + $0x8] sm:$0xff]   ;;  %v1511_v8 = vld [vmem:[%s2054_s2 + $0x10] sm:$0xff]   ;;  %vm530_vm4 = vcmask 392192  }
  0x38   : > { %s321_s20 = scalar_select %p320_p11, %s1746_s28, 1  ;;  %v407_v2 = vsel %vm405_vm0, 4294967295, %v1674_v1  ;;  %v1512_v11 = vld [vmem:[%s2055_s3] sm:$0xff]   ;;  %vm512_vm5 = vcmask 1039360   ;;  %vm505_vm6 = vcmask 7168   ;;  %v1513_v22 = vld [vmem:[%s2055_s3 + $0x8] sm:$0xff]  }
  0x39   : > { %v408_v3 = vsel %vm406_vm2, %v407_v2, 0  ;;  %1386 = vmatprep.mubr.msk.bf16.mxu1 %vm530_vm4, %v1512_v11  ;;  %s1675_s29 = smov 127   ;;  %s1676_s17 = smov 1   ;;  %vm1260_vm7 = vmneg %vm505_vm6  ;;  %vm618_vm8 = vcmask 1040384   ;;  %v1677_v27 = vmov 0   ;;  %v1514_v30 = vld [vmem:[%s2056_s4] sm:$0xff]  }
  0x3a   : > { %s1311_s22 = sshll.u32 %s321_s20, 3  ;;  %v620_v28 = vsel %vm618_vm8, 65535, %v1677_v27  ;;  %vm611_vm9 = vcmask 138240   ;;  %v1515_v48 = vld [vmem:[%s2056_s4 + $0x8] sm:$0xff]   ;;  %v1516_v49 = vld [vmem:[%s2054_s2 + $0x18] sm:$0xff]   ;;  %v1517_v52 = vld [vmem:[%s2054_s2 + $0x20] sm:$0xff]  }
  0x3b   : > { %s324_s12 = scalar_lea.vmem %s2052_s0, %s1311_s22  ;;  %v1877_v29 = vand.u32 1065369472, %v620_v28  ;;  %v1518_v57 = vld [vmem:[%s2055_s3 + $0x10] sm:$0xff]   ;;  %s1678_s18 = smov 126   ;;  %vm685_vm10 = vcmask 1031168   ;;  %vm679_vm11 = vcmask 15360  }
  0x3c   : > { %v1508_v4 = vld [vmem:[%s324_s12] sm:$0xff]   ;;  %s1679_s15 = smov 2   ;;  %vm1275_vm12 = vmneg %vm679_vm11  ;;  %v1522_v27 = vld [vmem:[%s2054_s2 + $0x28] sm:$0xff]   ;;  %s1680_s21 = smov 4   ;;  %vm854_vm13 = vcmask 1014784   ;;  %vm848_vm14 = vcmask 31744  }
  0x3d   : > { %v410_v6 = vand.u32 %v1508_v4, %v408_v3  ;;  %v1519_v3 = vld [vmem:[%s2055_s3 + $0x18] sm:$0xff]   ;;  %s1681_s9 = smov 124   ;;  %vm1294_vm15 = vmneg %vm848_vm14  ;;  %s1092_s22 = scalar_lea.sflag [#allocation7], %s1823_s8 }
  0x3e   : > { %p2071_p13 = scmp.ne.s32.totalorder %s2065_s13, 0 }
  0x3f   : > { %1351 = vmatpush3.bf16.msra.mxu0 %v410_v6 }
  0x40   : > { %1426 = vmatprep.subr.bf16.mxu0 %v1672_v0 }
  0x42   : > { %1353 = vmatmul.mubr.msk.bf16.vlgmr.msra.gmra.mxu0 %vm383_vm3, %v1509_v5 }
  0x43   : > { %1356 = vmatprep.mubr.msk.bf16.mxu0 %vm1673_vm1, %v1672_v0  ;;  %1427 = vmatpush3.bf16.msra.mxu0 %v1877_v29 }
  0x44   : > { %1428 = vmatprep.subr.bf16.mxu0 %v1672_v0 }
  0x4a   : > { %1357 = vmatmul.mubr.msk.bf16.gmra.mxu0 %vm383_vm3, %v1510_v7 }
  0x4b   : > { %1360 = vmatprep.mubr.msk.bf16.mxu0 %vm1673_vm1, %v1672_v0 }
  0x52   : > { %1361 = vmatmul.mubr.msk.bf16.gmra.mxu0 %vm383_vm3, %v1511_v8  ;;  %v1520_v8 = vld [vmem:[%s2056_s4 + $0x10] sm:$0xff]  }
  0x53   : > { %1364 = vmatprep.mubr.msk.bf16.mxu0 %vm1673_vm1, %v1672_v0 }
  0x5a   : > { %1365 = vmatmul.mubr.msk.bf16.gmra.mxu0 %vm383_vm3, %v1516_v49 }
  0x5b   : > { %1368 = vmatprep.mubr.msk.bf16.mxu0 %vm1673_vm1, %v1672_v0 }
  0x62   : > { %1369 = vmatmul.mubr.msk.bf16.gmra.mxu0 %vm383_vm3, %v1517_v52 }
  0x63   : > { %1372 = vmatprep.mubr.msk.bf16.mxu0 %vm1673_vm1, %v1672_v0 }
  0x6a   : > { %1373 = vmatmul.mubr.msk.bf16.gmra.mxu0 %vm383_vm3, %v1522_v27 }
  0x6b   : > { %1376 = vmatprep.mubr.msk.bf16.mxu0 %vm1673_vm1, %v1672_v0 }
 0x102   : > { %v1859_v9 = vpop.f32.mrf.mxu0 }
 0x104   : > { %v1354_v10 = vpop.f32.mrf.mxu0 }
 0x106   : > { %v1867_v12 = vpop.f32.mrf.mxu0 }
 0x107   : > { %v501_v13 = vpack.c.bf16 %v1867_v12, %v1859_v9 }
 0x108   : > { %v1355_v14 = vpop.f32.mrf.mxu0 }
 0x109   : > { %510 = vrot.lane.b32.xlu0 %v501_v13, %s1675_s29 }
 0x10a   : > { %v454_v15 = vpop.f32.mrf.mxu0 }
 0x10c   : > { %v1358_v16 = vpop.f32.mrf.mxu0 }
 0x10d   : > { %503 = vrot.lane.b32.xlu0 %v501_v13, %s1676_s17  ;;  %s1683_s17 = smov [#allocation6]  }
 0x10e   : > { %v457_v17 = vpop.f32.mrf.mxu0  ;;  %s1579_s12 = sshll.u32 %s1683_s17, 4  ;;  %s1580_s12 = int_to_ptr.vmem [resolvable:$false] %s1579_s12 }
 0x110   : > { %v1359_v18 = vpop.f32.mrf.mxu0 }
 0x112   : > { %v462_v23 = vpop.f32.mrf.mxu0 }
 0x114   : > { %v1362_v24 = vpop.f32.mrf.mxu0 }
 0x116   : > { %v465_v25 = vpop.f32.mrf.mxu0 }
 0x118   : > { %v1363_v26 = vpop.f32.mrf.mxu0 }
 0x119   : > { %v1521_v26 = vld [vmem:[%s2056_s4 + $0x18] sm:$0xff]  }
 0x11a   : > { %v470_v59 = vpop.f32.mrf.mxu0 }
 0x11c   : > { %v1366_v60 = vpop.f32.mrf.mxu0 }
 0x11e   : > { %v473_v61 = vpop.f32.mrf.mxu0 }
 0x120   : > { %v1367_v62 = vpop.f32.mrf.mxu0 }
 0x122   : > { %v478_v4 = vpop.f32.mrf.mxu0 }
 0x124   : > { %v1370_v5 = vpop.f32.mrf.mxu0 }
 0x125   : > { %v1526_v5 = vld [vmem:[%s2056_s4 + $0x28] sm:$0xff]  }
 0x126   : > { %v481_v6 = vpop.f32.mrf.mxu0 }
 0x128   : > { %v1371_v7 = vpop.f32.mrf.mxu0 }
 0x17b   : > { %v511_v19 = vpop.permute.xlu0 %510 }
 0x17c   : > { %1443 = vmatprep.subr.msk.bf16.mxu1 %vm512_vm5, %v511_v19  ;;  %v514_v20 = vsel %vm512_vm5, %v511_v19, 0 }
 0x17d   : > { %1381 = vmatpush3.bf16.msra.mxu1 %v514_v20 }
 0x17e   : > { %1382 = vmatprep.subr.bf16.mxu1 %v501_v13 }
 0x17f   : > { %v504_v21 = vpop.permute.xlu0 %503 }
 0x181   : > { %1383 = vmatpush3.bf16.msra.mxu1 %v501_v13 }
 0x182   : > { %1384 = vmatprep.subr.msk.bf16.mxu1 %vm1260_vm7, %v504_v21 }
 0x185   : > { %1385 = vmatpush3.bf16.msk.msra.mxu1 %vm1260_vm7, %v504_v21 }
 0x186   : > { %1390 = vmatprep.subr.bf16.mxu1 %v1877_v29 }
 0x188   : > { %1387 = vmatmul.mubr.msk.bf16.vlgmr.msra.gmra.mxu1 %vm530_vm4, %v1513_v22 }
 0x189   : > { %1391 = vmatpush3.bf16.msra.mxu1 %v1877_v29  ;;  %1394 = vmatprep.mubr.msk.bf16.mxu1 %vm611_vm9, %v1514_v30  ;;  %v1523_v30 = vld [vmem:[%s2054_s2 + $0x30] sm:$0xff]  }
 0x18a   : > { %1377 = vmatmul.mubr.msk.bf16.gmra.mxu0 %vm383_vm3, %v1523_v30 }
 0x18b   : > { %1430 = vmatprep.mubr.msk.bf16.mxu0 %vm1673_vm1, %v1672_v0 }
 0x248   : > { %v1388_v31 = vpop.f32.mrf.mxu1 }
 0x249   : > { %v580_v34 = vadd.f32 %v1388_v31, %v462_v23 }
 0x24a   : > { %v571_v32 = vpop.f32.mrf.mxu1 }
 0x24b   : > { %v572_v40 = vadd.f32 %v571_v32, %v454_v15 }
 0x24c   : > { %v1389_v33 = vpop.f32.mrf.mxu1 }
 0x24d   : > { %v583_v35 = vadd.f32 %v1389_v33, %v465_v25 }
 0x24e   : > { %v574_v38 = vpop.f32.mrf.mxu1 }
 0x24f   : > { %v587_v36 = vpack.c.bf16 %v583_v35, %v580_v34  ;;  %v575_v39 = vadd.f32 %v574_v38, %v457_v17  ;;  %v1524_v35 = vld [vmem:[%s2055_s3 + $0x20] sm:$0xff]  }
 0x251   : > { %v1264_v37 = vmul.bf16 3216621497, %v587_v36  ;;  %v586_v43 = vpack.c.bf16 %v575_v39, %v572_v40 }
 0x253   : > { %1527 = vpow.bf16 %v1264_v37  ;;  %v486_v37 = vpop.f32.mrf.mxu0 }
 0x255   : > { %v1374_v38 = vpop.f32.mrf.mxu0 }
 0x257   : > { %v489_v39 = vpop.f32.mrf.mxu0 }
 0x259   : > { %v1375_v40 = vpop.f32.mrf.mxu0 }
 0x261   : > { %v1528_v41 = vpop.eup %1527 }
 0x262   : > { %v593_v42 = vadd.bf16 1065369472, %v1528_v41 }
 0x264   : > { %1529 = vrcp.bf16 %v593_v42 }
 0x265   : > { %1531 = vtanh.bf16 %v586_v43 }
 0x272   : > { %v1530_v44 = vpop.eup %1529 }
 0x273   : > { %v595_v45 = vmul.bf16 1065369472, %v1530_v44  ;;  %v1532_v46 = vpop.eup %1531  ;;  %v1525_v44 = vld [vmem:[%s2055_s3 + $0x28] sm:$0xff]  }
 0x275   : > { %v596_v47 = vmul.bf16 %v1532_v46, %v595_v45  ;;  %v494_v45 = vpop.f32.mrf.mxu0 }
 0x277   : > { %1392 = vmatprep.subr.bf16.mxu1 %v596_v47  ;;  %v1378_v46 = vpop.f32.mrf.mxu0 }
 0x278   : > { %1393 = vmatpush3.bf16.msra.mxu1 %v596_v47 }
 0x279   : > { %v497_v47 = vpop.f32.mrf.mxu0 }
 0x27b   : > { %1395 = vmatmul.mubr.msk.bf16.vlgmr.msra.gmra.mxu1 %vm611_vm9, %v1515_v48  ;;  %v1379_v48 = vpop.f32.mrf.mxu0 }
 0x27c   : > { %1404 = vmatprep.mubr.msk.bf16.mxu1 %vm530_vm4, %v1518_v57 }
 0x33b   : > { %v1897_v50 = vpop.f32.mrf.mxu1 }
 0x33d   : > { %v658_v51 = vpop.f32.mrf.mxu1 }
 0x33e   : > { %v1908_v55 = vadd.f32 %v658_v51, %v1859_v9 }
 0x33f   : > { %v1902_v53 = vpop.f32.mrf.mxu1 }
 0x341   : > { %v661_v54 = vpop.f32.mrf.mxu1 }
 0x342   : > { %v1911_v56 = vadd.f32 %v661_v54, %v1867_v12 }
 0x344   : > { %v675_v58 = vpack.c.bf16 %v1911_v56, %v1908_v55 }
 0x346   : > { %683 = vrot.lane.b32.xlu1 %v675_v58, %s1678_s18  ;;  %s1240_s18 = sshll.u32 %s1823_s8, 1 }
 0x347   : > { %s319_s19 = scalar_lea.vmem [#allocation6], %s1240_s18  ;;  %s1581_s18 = scalar_lea.vmem %s1580_s12, 64 }
 0x34a   : > { %677 = vrot.lane.b32.xlu1 %v675_v58, %s1679_s15  ;;  %s1308_s15 = sshll.u32 %s1746_s28, 5 }
 0x34b   : > { %s1982_s20 = scalar_lea.hbm %s2059_s7, %s1308_s15 }
 0x3b8   : > { %v684_v63 = vpop.permute.xlu1 %683 }
 0x3b9   : > { %v687_v1 = vsel %vm685_vm10, %v684_v63, 0  ;;  %1444 = vmatprep.subr.msk.bf16.mxu1 %vm685_vm10, %v684_v63 }
 0x3ba   : > { %1399 = vmatpush3.bf16.msra.mxu1 %v687_v1 }
 0x3bb   : > { %1400 = vmatprep.subr.bf16.mxu1 %v675_v58 }
 0x3bc   : > { %v678_v2 = vpop.permute.xlu1 %677 }
 0x3be   : > { %1401 = vmatpush3.bf16.msra.mxu1 %v675_v58 }
 0x3bf   : > { %1402 = vmatprep.subr.msk.bf16.mxu1 %vm1275_vm12, %v678_v2 }
 0x3c2   : > { %1403 = vmatpush3.bf16.msk.msra.mxu1 %vm1275_vm12, %v678_v2 }
 0x3c3   : > { %1408 = vmatprep.subr.bf16.mxu1 %v1877_v29 }
 0x3c5   : > { %1405 = vmatmul.mubr.msk.bf16.vlgmr.msra.gmra.mxu1 %vm530_vm4, %v1519_v3 }
 0x3c6   : > { %1409 = vmatpush3.bf16.msra.mxu1 %v1877_v29  ;;  %1412 = vmatprep.mubr.msk.bf16.mxu1 %vm611_vm9, %v1520_v8 }
 0x485   : > { %v1406_v9 = vpop.f32.mrf.mxu1 }
 0x486   : > { %v753_v12 = vadd.f32 %v1406_v9, %v478_v4 }
 0x487   : > { %v744_v10 = vpop.f32.mrf.mxu1 }
 0x488   : > { %v745_v18 = vadd.f32 %v744_v10, %v470_v59 }
 0x489   : > { %v1407_v11 = vpop.f32.mrf.mxu1 }
 0x48a   : > { %v756_v13 = vadd.f32 %v1407_v11, %v481_v6  ;;  %v1682_v6 = vmov 1.0  }
 0x48b   : > { %v747_v16 = vpop.f32.mrf.mxu1 }
 0x48c   : > { %v760_v14 = vpack.c.bf16 %v756_v13, %v753_v12  ;;  %v748_v17 = vadd.f32 %v747_v16, %v473_v61 }
 0x48e   : > { %v1279_v15 = vmul.bf16 3216621497, %v760_v14  ;;  %v759_v21 = vpack.c.bf16 %v748_v17, %v745_v18 }
 0x490   : > { %1533 = vpow.bf16 %v1279_v15  ;;  %v993_v15 = vld [vmem:[%s2057_s5] sm:$0xf] }
 0x49e   : > { %v1534_v19 = vpop.eup %1533 }
 0x49f   : > { %v766_v20 = vadd.bf16 1065369472, %v1534_v19 }
 0x4a1   : > { %1535 = vrcp.bf16 %v766_v20 }
 0x4a2   : > { %1537 = vtanh.bf16 %v759_v21 }
 0x4af   : > { %v1536_v22 = vpop.eup %1535 }
 0x4b0   : > { %v768_v23 = vmul.bf16 1065369472, %v1536_v22  ;;  %v1538_v24 = vpop.eup %1537 }
 0x4b2   : > { %v769_v25 = vmul.bf16 %v1538_v24, %v768_v23 }
 0x4b4   : > { %1410 = vmatprep.subr.bf16.mxu1 %v769_v25 }
 0x4b5   : > { %1411 = vmatpush3.bf16.msra.mxu1 %v769_v25 }
 0x4b8   : > { %1413 = vmatmul.mubr.msk.bf16.vlgmr.msra.gmra.mxu1 %vm611_vm9, %v1521_v26 }
 0x4b9   : > { %1422 = vmatprep.mubr.msk.bf16.mxu1 %vm530_vm4, %v1524_v35 }
 0x578   : > { %v1939_v28 = vpop.f32.mrf.mxu1 }
 0x579   : > { %v842_v11 = vadd.f32 %v1939_v28, %v1897_v50 }
 0x57a   : > { %v825_v29 = vpop.f32.mrf.mxu1 }
 0x57b   : > { %v840_v33 = vadd.f32 %v825_v29, %v1908_v55 }
 0x57c   : > { %v1944_v31 = vpop.f32.mrf.mxu1 }
 0x57d   : > { %v843_v9 = vadd.f32 %v1944_v31, %v1902_v53 }
 0x57e   : > { %v828_v32 = vpop.f32.mrf.mxu1 }
 0x57f   : > { %v841_v34 = vadd.f32 %v828_v32, %v1911_v56 }
 0x581   : > { %v844_v36 = vpack.c.bf16 %v841_v34, %v840_v33 }
 0x583   : > { %846 = vrot.lane.b32.xlu1 %v844_v36, %s1680_s21  ;;  %852 = vrot.lane.b32.xlu0 %v844_v36, %s1681_s9  ;;  %s1118_s21 = sshll.u32 %s319_s19, 4  ;;  %s1984_s21 = int_to_ptr.vmem [resolvable:$true] %s1118_s21 }
 0x584   : > { %s1575_s29 = scalar_lea.vmem %s1984_s21, 32  ;;  %p1582_p5 = scmp.lt.s32.totalorder %s1984_s21, %s1580_s12 }
 0x585   : > { %p1576_p12 = scmp.ne.s32.totalorder %s1984_s21, %s1575_s29  ;;  %p1583_p8 = scmp.lt.s32.totalorder %s1581_s18, %s1575_s29 }
 0x587   : > { %p1577_p1 = pnand %p1576_p12, %p2071_p13  ;;  %p1584_p10 = por %p1583_p8, %p1582_p5 }
 0x589   : > { %p1578_p3 = pneg %p1577_p1 }
 0x58b   : > { %p1585_p2 = pnand %p1584_p10, %p1578_p3 }
 0x5f5   : > { %v853_v41 = vpop.permute.xlu0 %852  ;;  %v847_v43 = vpop.permute.xlu1 %846 }
 0x5f6   : > { %v856_v42 = vsel %vm854_vm13, %v853_v41, 0  ;;  %1445 = vmatprep.subr.msk.bf16.mxu1 %vm854_vm13, %v853_v41 }
 0x5f7   : > { %1417 = vmatpush3.bf16.msra.mxu1 %v856_v42 }
 0x5f8   : > { %1418 = vmatprep.subr.bf16.mxu1 %v844_v36 }
 0x5fb   : > { %1419 = vmatpush3.bf16.msra.mxu1 %v844_v36 }
 0x5fc   : > { %1420 = vmatprep.subr.msk.bf16.mxu1 %vm1294_vm15, %v847_v43 }
 0x5ff   : > { %1421 = vmatpush3.bf16.msk.msra.mxu1 %vm1294_vm15, %v847_v43 }
 0x600   : > { %1434 = vmatprep.subr.mxu1 %v1672_v0 }
 0x602   : > { %1423 = vmatmul.mubr.msk.bf16.vlgmr.msra.gmra.mxu1 %vm530_vm4, %v1525_v44 }
 0x603   : > { %1440 = vmatprep.mubr.msk.f32.mxu1 %vm1673_vm1, %v1672_v0  ;;  %1435 = vmatpush3.msk.msra.mxu1 %vm618_vm8, %v1682_v6 }
 0x604   : > { %1436 = vmatprep.subr.mxu1 %v1672_v0 }
 0x6c2   : > { %v1424_v49 = vpop.f32.mrf.mxu1 }
 0x6c3   : > { %v922_v54 = vadd.f32 %v1424_v49, %v494_v45 }
 0x6c4   : > { %v913_v51 = vpop.f32.mrf.mxu1 }
 0x6c5   : > { %v914_v60 = vadd.f32 %v913_v51, %v486_v37 }
 0x6c6   : > { %v1425_v52 = vpop.f32.mrf.mxu1 }
 0x6c7   : > { %v925_v55 = vadd.f32 %v1425_v52, %v497_v47 }
 0x6c8   : > { %v916_v58 = vpop.f32.mrf.mxu1 }
 0x6c9   : > { %v929_v56 = vpack.c.bf16 %v925_v55, %v922_v54  ;;  %v917_v59 = vadd.f32 %v916_v58, %v489_v39 }
 0x6cb   : > { %v1298_v57 = vmul.bf16 3216621497, %v929_v56  ;;  %v928_v63 = vpack.c.bf16 %v917_v59, %v914_v60 }
 0x6cd   : > { %1539 = vpow.bf16 %v1298_v57 }
 0x6db   : > { %v1540_v61 = vpop.eup %1539 }
 0x6dc   : > { %v935_v62 = vadd.bf16 1065369472, %v1540_v61 }
 0x6de   : > { %1541 = vrcp.bf16 %v935_v62 }
 0x6df   : > { %1543 = vtanh.bf16 %v928_v63 }
 0x6ec   : > { %v1542_v1 = vpop.eup %1541 }
 0x6ed   : > { %v937_v2 = vmul.bf16 1065369472, %v1542_v1  ;;  %v1544_v3 = vpop.eup %1543 }
 0x6ef   : > { %v938_v4 = vmul.bf16 %v1544_v3, %v937_v2 }
 0x6f1   : > { %1429 = vmatpush3.bf16.msra.mxu0 %v938_v4 }
 0x6f4   : > { %1431 = vmatmul.mubr.msk.bf16.vlgmr.msra.gmra.mxu0 %vm611_vm9, %v1526_v5 }
 0x7b4   : > { %v984_v7 = vpop.f32.mrf.mxu0 }
 0x7b5   : > { %v991_v14 = vadd.f32 %v984_v7, %v842_v11 }
 0x7b6   : > { %v1432_v8 = vpop.f32.mrf.mxu0 }
 0x7b8   : > { %v987_v10 = vpop.f32.mrf.mxu0 }
 0x7b9   : > { %v992_v12 = vadd.f32 %v987_v10, %v843_v9 }
 0x7ba   : > { %v1433_v13 = vpop.f32.mrf.mxu0 }
 0x7bb   : > { %1437 = vmatpush3.msra.mxu1 %v992_v12 }
 0x7bc   : > { %1438 = vmatprep.subr.mxu1 %v1672_v0 }
 0x7bd   : > { %1439 = vmatpush3.msra.mxu1 %v991_v14 }
 0x7be   : > { %1441 = vmatmul.mubr.msk.f32.vlgmr.msra.gmra.mxu1 %vm611_vm9, %v993_v15 }
 0x87e   : > { %v1066_v50 = vpop.f32.mrf.mxu1 }
 0x87f   : > { %v1072_v0 = vmul.f32 1.442695, %v1066_v50  ;;  %1085 = vst [vmem:[%s319_s19] sm:$0x3] %v1066_v50 }
 0x880   : > { %v1442_v53 = vpop.f32.mrf.mxu1 }
 0x881   : > { %1588 = shalt.err (!%p1585_p2)
}
 0x882   : > { %s1589_s15 = scalar_lea.hbm %s1982_s20, 32  ;;  %s1593_s11 = scalar_lea.hbm %s2059_s7, 64 }
 0x883   : > { %p1590_p4 = scmp.ne.s32.totalorder %s1982_s20, %s1589_s15  ;;  %p1594_p0 = scmp.lt.s32.totalorder %s1982_s20, %s2059_s7 }
 0x884   : > { %p1595_p6 = scmp.lt.s32.totalorder %s1593_s11, %s1589_s15 }
 0x885   : > { %p1591_p9 = pnand %p1590_p4, %p2071_p13 }
 0x886   : > { %p1596_p11 = por %p1595_p6, %p1594_p0 }
 0x887   : > { %p1592_p7 = pneg %p1591_p9 }
 0x889   : > { %p1597_p12 = pnand %p1596_p11, %p1592_p7 }
 0x88b   : > { %1600 = shalt.err (!%p1597_p12)
}
 0x88c   : > { %1449 = dma.vmem_to_hbm [thread:$0]  (%p2071_p13), %s1984_s21, 32, %s1982_s20, %s1092_s22   ;;  %1545 = vpow2.f32 %v1072_v0  ;;  %v1071_v16 = vld [vmem:[%s1829_s23 + $0x2] sm:$0x3]  ;;  %v1076_v19 = vrot.slane %v1066_v50, 2  ;;  %v1070_v21 = vld [vmem:[%s1829_s23] sm:$0x3] }
 0x88d   : > { %s1307_s16 = sshll.u32 %s1746_s28, 6  ;;  %s2072_s29 = sshll.u32 %s1823_s8, 2  ;;  %vm1082_vm0 = vcmask 1041408  }
 0x88e   : > { %s312_s12 = scalar_lea.vmem [#allocation5], %s2072_s29  ;;  %s2015_s9 = scalar_lea.hbm %s2058_s6, %s1307_s16 }
 0x88f   : > { %s1105_s18 = sshll.u32 %s312_s12, 4  ;;  %s1087_s21 = scalar_lea.sflag [#allocation4], %s1823_s8  ;;  %s1106_s18 = int_to_ptr.vmem [resolvable:$true] %s1105_s18 }
 0x890   : > { %s1601_s20 = scalar_lea.vmem %s1106_s18, 64  ;;  %s1684_s28 = smov [#allocation5]  }
 0x891   : > { %p1602_p1 = scmp.ne.s32.totalorder %s1106_s18, %s1601_s20  ;;  %s1605_s22 = sshll.u32 %s1684_s28, 4  ;;  %s1606_s22 = int_to_ptr.vmem [resolvable:$false] %s1605_s22 }
 0x892   : > { %s1607_s23 = scalar_lea.vmem %s1606_s22, 128  ;;  %p1608_p8 = scmp.lt.s32.totalorder %s1106_s18, %s1606_s22 }
 0x893   : > { %p1603_p3 = pnand %p1602_p1, %p2071_p13  ;;  %p1609_p10 = scmp.lt.s32.totalorder %s1607_s23, %s1601_s20 }
 0x895   : > { %p1604_p5 = pneg %p1603_p3  ;;  %p1610_p2 = por %p1609_p10, %p1608_p8 }
 0x897   : > { %p1611_p4 = pnand %p1610_p2, %p1604_p5 }
 0x899   : > { %v1546_v17 = vpop.eup %1545 }
 0x89a   : > { %v1074_v18 = vmul.f32 %v1546_v17, %v1071_v16 }
 0x89c   : > { %v1078_v20 = vadd.f32 %v1076_v19, %v1074_v18 }
 0x89e   : > { %v1080_v22 = vrot.slane %v1078_v20, 6 }
 0x8a0   : > { %v1083_v23 = vsel %vm1082_vm0, %v1070_v21, %v1080_v22 }
 0x8a1   : > { %1084 = vst [vmem:[%s312_s12] sm:$0xf] %v1083_v23 }
 0x8a2   : > { %1614 = shalt.err (!%p1611_p4)
}
 0x8a3   : > { %s1615_s11 = scalar_lea.hbm %s2015_s9, 64  ;;  %s1619_s16 = scalar_lea.hbm %s2058_s6, 128 }
 0x8a4   : > { %p1616_p9 = scmp.ne.s32.totalorder %s2015_s9, %s1615_s11  ;;  %p1620_p6 = scmp.lt.s32.totalorder %s2015_s9, %s2058_s6 }
 0x8a5   : > { %p1621_p11 = scmp.lt.s32.totalorder %s1619_s16, %s1615_s11 }
 0x8a6   : > { %p1617_p7 = pnand %p1616_p9, %p2071_p13 }
 0x8a7   : > { %p1622_p12 = por %p1621_p11, %p1620_p6 }
 0x8a8   : > { %p1618_p0 = pneg %p1617_p7 }
 0x8aa   : > { %p1623_p1 = pnand %p1622_p12, %p1618_p0 }
 0x8ac   : > { %1626 = shalt.err (!%p1623_p1)
}
 0x8ad   : > { %1448 = dma.vmem_to_hbm [thread:$0]  (%p2071_p13), %s1106_s18, 64, %s2015_s9, %s1087_s21  }
 0x8ae PF: > { %s1130_s15 = sand.u32 1, %s1657_s24   ;;  %p2073_p3 = scmp.ne.s32.totalorder %s2066_s14, 0 }
 0x8af   : > { %p2074_p5 = scmp.ge.s32.totalorder %s1669_s27, 2  ;;  %s1131_s19 = scalar_lea.sflag [#allocation4], %s1130_s15 }
 0x8b1   : > { %p1457_p8 = pnand %p2074_p5, %p2073_p3 }
 0x8b3   : > { %p1458_p10 = pneg %p1457_p8 }
 0x8b5   : > { %1648 = dma.done.wait (%p1458_p10), %s1131_s19, 64  }
 0x8b6   : > { %1650 = vsyncadd (%p1458_p10), %s1131_s19, 4294967232  ;;  %s1140_s20 = scalar_lea.sflag [#allocation7], %s1130_s15 }
 0x8b7   : > { %1652 = dma.done.wait (%p1458_p10), %s1140_s20, 32  }
 0x8b8   : > { %1654 = vsyncadd (%p1458_p10), %s1140_s20, 4294967264  ;;  %p24_p13 = scmp.ge.s32.totalorder %s1750_s30, 4   ;;  %s2075_s24 = smov %s1661_s25 }
 0x8b9   : > { %s2076_s25 = smov %s1665_s26  ;;  %s2077_s26 = smov %s1762_s10 }
 0x8ba   : > { %s2078_s27 = smov %s1750_s30  ;;  %26 = sbr.rel (!%p24_p13) target bundleno = 7 (0x7), region = 113 }
 0x8bf   :  { %1145 = vsyncpa [#allocation3], 1 }
 0x8c0   :  { %1147 = vsyncpa [#allocation3 + $0x1], 1 }
 0x8c1   :  { %1148 = vsyncpa [#allocation4], 1 }
 0x8c2   :  { %1150 = vsyncpa [#allocation4 + $0x1], 1 }
 0x8c3   :  { %1151 = vsyncpa [#allocation7], 1 }
 0x8c4   :  { %1153 = vsyncpa [#allocation7 + $0x1], 1 }

</bundles_post_ra>
